<compile_context>
chip_gen: v7x
topology: tpu7x:2x2x1
jax: 0.10.0
libtpu: 0.0.40
codegen_flags: <defaults>
</compile_context>

<pallas_src>
import functools

import jax
import jax.numpy as jnp
from jax.experimental import pallas as pl
from jax.experimental.pallas import tpu as pltpu


# ----------------------------- kernels --------------------------------------


def mycell_kernel(x_ref, wt_ref, h_ref, b_ref, out_ref):
    # Single K pass: fused matmul (MXU, f32 accumulation) + bias + h + tanh epilogue.
    # No VMEM accumulator scratch, no init/finalize branches.
    out_ref[...] = jnp.tanh(
        jnp.dot(x_ref[...], wt_ref[...], preferred_element_type=jnp.float32)
        + b_ref[...] + h_ref[...]).astype(out_ref.dtype)


def mycell_kernel_ktiled(x_ref, wt_ref, h_ref, b_ref, out_ref, acc_ref):
    # Fallback for K too large for a single pass: f32 VMEM accumulator across k steps.
    k = pl.program_id(2)

    @pl.when(k == 0)
    def _():
        acc_ref[...] = jnp.zeros_like(acc_ref)

    acc_ref[...] += jnp.dot(x_ref[...], wt_ref[...],
                            preferred_element_type=jnp.float32)

    @pl.when(k == pl.num_programs(2) - 1)
    def _():
        out_ref[...] = jnp.tanh(
            acc_ref[...] + b_ref[...] + h_ref[...]).astype(out_ref.dtype)


# ----------------------------- helpers ---------------------------------------


def _round_up(n, m):
    return ((n + m - 1) // m) * m


def _pad2(a, rows, cols):
    r, c = a.shape
    if (r, c) == (rows, cols):
        return a
    return jnp.pad(a, ((0, rows - r), (0, cols - c)))


def _pick_tile(extent, granule, cap):
    """Pick (tile, padded_extent): tile is a multiple of `granule`, <= cap.

    Prefers the fewest grid blocks whose total padding waste is small (<= ~6%),
    otherwise takes the minimal-padding candidate.  Avoids rounding the padded
    extent up by a whole extra tile (the main waste in the previous version).
    """
    cap = max(cap, granule)
    req = _round_up(extent, granule)
    if req <= cap:
        return req, req
    candidates = []
    for nb in range(1, req // granule + 1):
        tile = _round_up(-(-req // nb), granule)
        if tile > cap:
            continue
        candidates.append((tile, nb * tile))
    min_pad = min(p for _, p in candidates)
    for tile, padded in candidates:          # ordered by increasing block count
        if (padded - min_pad) * 16 <= req:   # accept <= ~6.25% extra waste
            return tile, padded
    return candidates[-1]


def _is_megacore():
    # v7x has 2 TensorCores per chip; give both cores a parallel block when possible.
    try:
        return any("v7" in d.device_kind.lower() for d in jax.devices())
    except Exception:  # pragma: no cover - defensive; default to single-core layout
        return False


# ----------------------------- wrapper ----------------------------------------


@functools.partial(jax.jit,
                   static_argnames=("tm_cap", "tn_cap", "tk_cap", "mxu_dtype"))
def mycell_forward(x, h, w, b, *, tm_cap=512, tn_cap=256, tk_cap=2048,
                   mxu_dtype=jnp.bfloat16):
    """new_h = tanh(x @ w.T + b + h); returns (new_h, new_h).

    Note: MXU operands are cast to bf16 (f32 accumulation + f32 epilogue), so
    results match f32 Linear semantics only to bf16-matmul tolerance.
    """
    N, F_in = x.shape
    F_out = w.shape[0]
    out_dtype = x.dtype

    # Tile selection: minimal-waste tiles at (8,128) granularity.
    TM, M_p = _pick_tile(N, 8, tm_cap)
    TN, N_p = _pick_tile(F_out, 128, tn_cap)
    TK, K_p = _pick_tile(F_in, 128, tk_cap)

    # v7x megacore: ensure >= 2 parallel blocks when the problem allows it.
    if _is_megacore() and (M_p // TM) * (N_p // TN) == 1:
        m_req = _round_up(N, 8)
        n_req = _round_up(F_out, 128)
        if m_req >= 16:
            TM = _round_up(-(-m_req // 2), 8)
            M_p = 2 * TM
        elif n_req >= 256:
            TN = _round_up(-(-n_req // 2), 128)
            N_p = 2 * TN

    Mb, Nb, Kb = M_p // TM, N_p // TN, K_p // TK

    # Wrapper glue (once per call): zero-pad to tile multiples, transpose W once so
    # the MXU gets a lane-dense (K, N) RHS, cast MXU operands to bf16.  Zero padding
    # contributes exactly 0 to the matmul; padded rows/cols are sliced off below.
    x_p = _pad2(x, M_p, K_p).astype(mxu_dtype)
    wt_p = _pad2(w.T, K_p, N_p).astype(mxu_dtype)
    h_p = _pad2(h, M_p, N_p).astype(jnp.float32)
    b_p = _pad2(b.reshape(1, F_out), 1, N_p).astype(jnp.float32)

    compiler_params_2d = pltpu.CompilerParams(
        dimension_semantics=("parallel", "parallel"),
        # Double-buffered tiles at the default caps are ~8 MiB; 48 MiB leaves
        # headroom on v7x's 64 MiB physical VMEM and is ample on v5e/v6e.
        vmem_limit_bytes=48 * 1024 * 1024,
    )

    if Kb == 1:
        # Preferred path: single K pass, no accumulator, direct fused epilogue.
        out_p = pl.pallas_call(
            mycell_kernel,
            out_shape=jax.ShapeDtypeStruct((M_p, N_p), out_dtype),
            grid_spec=pltpu.PrefetchScalarGridSpec(
                num_scalar_prefetch=0,
                grid=(Mb, Nb),
                in_specs=[
                    pl.BlockSpec((TM, TK), lambda i, j: (i, 0)),   # x
                    pl.BlockSpec((TK, TN), lambda i, j: (0, j)),   # W^T
                    pl.BlockSpec((TM, TN), lambda i, j: (i, j)),   # h
                    pl.BlockSpec((1, TN), lambda i, j: (0, j)),    # bias
                ],
                out_specs=pl.BlockSpec((TM, TN), lambda i, j: (i, j)),
            ),
            compiler_params=compiler_params_2d,
        )(x_p, wt_p, h_p, b_p)
    else:
        # Fallback for very large K: reduction axis last, f32 VMEM accumulator.
        out_p = pl.pallas_call(
            mycell_kernel_ktiled,
            out_shape=jax.ShapeDtypeStruct((M_p, N_p), out_dtype),
            grid_spec=pltpu.PrefetchScalarGridSpec(
                num_scalar_prefetch=0,
                grid=(Mb, Nb, Kb),
                in_specs=[
                    pl.BlockSpec((TM, TK), lambda i, j, k: (i, k)),   # x
                    pl.BlockSpec((TK, TN), lambda i, j, k: (k, j)),   # W^T
                    pl.BlockSpec((TM, TN), lambda i, j, k: (i, j)),   # h
                    pl.BlockSpec((1, TN), lambda i, j, k: (0, j)),    # bias
                ],
                out_specs=pl.BlockSpec((TM, TN), lambda i, j, k: (i, j)),
                scratch_shapes=[pltpu.VMEM((TM, TN), jnp.float32)],
            ),
            compiler_params=pltpu.CompilerParams(
                dimension_semantics=("parallel", "parallel", "arbitrary"),
                vmem_limit_bytes=48 * 1024 * 1024,
            ),
        )(x_p, wt_p, h_p, b_p)

    new_h = out_p[:N, :F_out]
    return new_h, new_h


# ----------------------------- main -------------------------------------------


if __name__ == "__main__":
    key = jax.random.PRNGKey(0)
    kx, kh, kw, kb = jax.random.split(key, 4)

    # Shapes implied by the module: x, h are (3, 4); Linear(4, 4).
    N, F = 3, 4
    x = jax.random.uniform(kx, (N, F), dtype=jnp.float32)
    h = jax.random.uniform(kh, (N, F), dtype=jnp.float32)
    # Deterministic synthetic parameters (not a checkpoint load).
    w = jax.random.uniform(kw, (F, F), dtype=jnp.float32) * 0.5 - 0.25
    b = jax.random.uniform(kb, (F,), dtype=jnp.float32) * 0.5 - 0.25

    new_h, new_h_dup = mycell_forward(x, h, w, b)
    jax.block_until_ready(new_h)

    # Reference check (module semantics in f32); bf16 MXU inputs -> relaxed atol.
    ref = jnp.tanh(x @ w.T + b + h)
    assert new_h.shape == (N, F)
    assert jnp.allclose(new_h, ref, atol=1e-2), "mismatch vs reference (toy shapes)"
    assert jnp.array_equal(new_h, new_h_dup)

    # Exercise the multi-tile single-K-pass path with ragged dims (TM=264, TN=128).
    N2, K2, O2 = 520, 1024, 384
    kx2, kh2, kw2, kb2 = jax.random.split(jax.random.PRNGKey(0), 4)
    x2 = jax.random.uniform(kx2, (N2, K2), dtype=jnp.float32)
    h2 = jax.random.uniform(kh2, (N2, O2), dtype=jnp.float32)
    w2 = jax.random.uniform(kw2, (O2, K2), dtype=jnp.float32) * 0.1 - 0.05
    b2 = jax.random.uniform(kb2, (O2,), dtype=jnp.float32) * 0.1 - 0.05

    # Reference with matched MXU precision (bf16 inputs, f32 accumulation/epilogue).
    ref2 = jnp.tanh(
        jnp.dot(x2.astype(jnp.bfloat16), w2.T.astype(jnp.bfloat16),
                preferred_element_type=jnp.float32) + b2 + h2)

    new_h2, _ = mycell_forward(x2, h2, w2, b2)
    jax.block_until_ready(new_h2)
    assert jnp.allclose(new_h2, ref2, atol=5e-3), "mismatch (single-K-pass tiled)"

    # Force the K-tiled fallback path (tk_cap=512 -> 2 K steps) and re-check.
    new_h3, _ = mycell_forward(x2, h2, w2, b2, tk_cap=512)
    jax.block_until_ready(new_h3)
    assert jnp.allclose(new_h3, ref2, atol=5e-3), "mismatch (K-tiled fallback)"

    print("KERNEL_OK")
</pallas_src>

<mosaic_0001>
module attributes {stable_mosaic.version = 11 : i64} {
  func.func @mycell_kernel(%arg0: i32, %arg1: i32, %arg2: memref<8x128xbf16, #tpu.memory_space<vmem>>, %arg3: memref<128x128xbf16, #tpu.memory_space<vmem>>, %arg4: memref<8x128xf32, #tpu.memory_space<vmem>>, %arg5: memref<1x128xf32, #tpu.memory_space<vmem>>, %arg6: memref<8x128xf32, #tpu.memory_space<vmem>>) attributes {dimension_semantics = [#tpu.dimension_semantics<parallel>, #tpu.dimension_semantics<parallel>], iteration_bounds = array<i64: 1, 1>, scalar_prefetch = 0 : i64, scratch_operands = 0 : i64, tpu.core_type = #tpu.core_type<tc>, window_params = [{transform_indices = @transform_0, window_bounds = array<i64: 8, 128>}, {transform_indices = @transform_1, window_bounds = array<i64: 128, 128>}, {transform_indices = @transform_2, window_bounds = array<i64: 8, 128>}, {transform_indices = @transform_3, window_bounds = array<i64: 1, 128>}, {transform_indices = @transform_4, window_bounds = array<i64: 8, 128>}]} {
    %c0 = arith.constant 0 : index
    %c0_0 = arith.constant 0 : index
    %0 = vector.load %arg2[%c0, %c0_0] : memref<8x128xbf16, #tpu.memory_space<vmem>>, vector<8x128xbf16>
    %c0_1 = arith.constant 0 : index
    %c0_2 = arith.constant 0 : index
    %1 = vector.load %arg3[%c0_1, %c0_2] : memref<128x128xbf16, #tpu.memory_space<vmem>>, vector<128x128xbf16>
    %cst = arith.constant dense<0.000000e+00> : vector<8x128xf32>
    %2 = tpu.matmul %0, %1, %cst {dimension_numbers = #tpu.dot_dimension_numbers<[1], [0], [0], [1], [0, 0, 1, 1], [], []>} : vector<8x128xbf16>, vector<128x128xbf16>, vector<8x128xf32> -> vector<8x128xf32>
    %c0_3 = arith.constant 0 : index
    %c0_4 = arith.constant 0 : index
    %3 = vector.load %arg5[%c0_3, %c0_4] : memref<1x128xf32, #tpu.memory_space<vmem>>, vector<1x128xf32>
    %4 = vector.broadcast %3 : vector<1x128xf32> to vector<8x128xf32>
    %5 = arith.addf %2, %4 : vector<8x128xf32>
    %c0_5 = arith.constant 0 : index
    %c0_6 = arith.constant 0 : index
    %6 = vector.load %arg4[%c0_5, %c0_6] : memref<8x128xf32, #tpu.memory_space<vmem>>, vector<8x128xf32>
    %7 = arith.addf %5, %6 : vector<8x128xf32>
    %8 = math.tanh %7 : vector<8x128xf32>
    %c0_7 = arith.constant 0 : index
    %c0_8 = arith.constant 0 : index
    %9 = vector.load %arg6[%c0_7, %c0_8] : memref<8x128xf32, #tpu.memory_space<vmem>>, vector<8x128xf32>
    tpu.vector_store %arg6[%c0_7, %c0_8], %8 {strides = array<i32>} : memref<8x128xf32, #tpu.memory_space<vmem>>, vector<8x128xf32>,
    return
  }
  func.func @transform_0(%arg0: i32, %arg1: i32) -> (i32, i32) {
    %c0_i32 = arith.constant 0 : i32
    %c0_i32_0 = arith.constant 0 : i32
    return %arg0, %c0_i32 : i32, i32
  }
  func.func @transform_1(%arg0: i32, %arg1: i32) -> (i32, i32) {
    %c0_i32 = arith.constant 0 : i32
    %c0_i32_0 = arith.constant 0 : i32
    return %c0_i32, %arg1 : i32, i32
  }
  func.func @transform_2(%arg0: i32, %arg1: i32) -> (i32, i32) {
    %c0_i32 = arith.constant 0 : i32
    return %arg0, %arg1 : i32, i32
  }
  func.func @transform_3(%arg0: i32, %arg1: i32) -> (i32, i32) {
    %c0_i32 = arith.constant 0 : i32
    %c0_i32_0 = arith.constant 0 : i32
    return %c0_i32, %arg1 : i32, i32
  }
  func.func @transform_4(%arg0: i32, %arg1: i32) -> (i32, i32) {
    %c0_i32 = arith.constant 0 : i32
    return %arg0, %arg1 : i32, i32
  }
}

</mosaic_0001>

<bundles_post_ra>
// kernel: mycell_forward.1
= control target key start
LH: loop header
LB: loop body
LE: loop exit
PB: predicated region body
PF: predicated region fallthrough
CT: control target
= control target key end

     0   :  { %v188_v0 = vmov 0.0   ;;  %vm189_vm0 = vmmov 0   ;;  %s251_s1 = inlined_call_operand.vmem [shape: bf16[128,128], index: 1, kind: input, shape index: {}]   ;;  %s252_s0 = inlined_call_operand.vmem [shape: bf16[8,128], index: 0, kind: input, shape index: {}]   ;;  %s253_s3 = inlined_call_operand.vmem [shape: f32[1,128], index: 3, kind: input, shape index: {}]   ;;  %s254_s2 = inlined_call_operand.vmem [shape: f32[8,128], index: 2, kind: input, shape index: {}]   ;;  %s255_s4 = inlined_call_operand.vmem [shape: f32[8,128], index: 4, kind: output, shape index: {}]  }
   0x1   :  { %156 = vmatprep.subr.bf16.mxu0 %v188_v0  ;;  %v178_v1 = vld [vmem:[%s251_s1] sm:$0xff]   ;;  %172 = vmatprep.mubr.msk.bf16.mxu0 %vm189_vm0, %v188_v0  ;;  %v179_v2 = vld [vmem:[%s251_s1 + $0x8] sm:$0xff]   ;;  %v180_v3 = vld [vmem:[%s251_s1 + $0x10] sm:$0xff]  }
   0x2   :  { %157 = vmatpush3.bf16.msra.mxu0 %v178_v1  ;;  %v181_v4 = vld [vmem:[%s251_s1 + $0x18] sm:$0xff]   ;;  %v182_v5 = vld [vmem:[%s251_s1 + $0x20] sm:$0xff]   ;;  %v183_v6 = vld [vmem:[%s251_s1 + $0x28] sm:$0xff]  }
   0x3   :  { %158 = vmatprep.subr.bf16.mxu0 %v188_v0  ;;  %v184_v7 = vld [vmem:[%s251_s1 + $0x30] sm:$0xff]   ;;  %v185_v8 = vld [vmem:[%s251_s1 + $0x38] sm:$0xff]   ;;  %v18_v9 = vld [vmem:[%s252_s0] sm:$0xf] }
   0x4   :  { %v138_v10 = vld [vmem:[%s253_s3] ss:$0 sm:$0xff] }
   0x5   :  { %v130_v12 = vld [vmem:[%s254_s2] sm:$0xff] }
   0x6   :  { %159 = vmatpush3.bf16.msra.mxu0 %v179_v2 }
   0x7   :  { %160 = vmatprep.subr.bf16.mxu0 %v188_v0 }
   0xa   :  { %161 = vmatpush3.bf16.msra.mxu0 %v180_v3 }
   0xb   :  { %162 = vmatprep.subr.bf16.mxu0 %v188_v0 }
   0xe   :  { %163 = vmatpush3.bf16.msra.mxu0 %v181_v4 }
   0xf   :  { %164 = vmatprep.subr.bf16.mxu0 %v188_v0 }
  0x12   :  { %165 = vmatpush3.bf16.msra.mxu0 %v182_v5 }
  0x13   :  { %166 = vmatprep.subr.bf16.mxu0 %v188_v0 }
  0x16   :  { %167 = vmatpush3.bf16.msra.mxu0 %v183_v6 }
  0x17   :  { %168 = vmatprep.subr.bf16.mxu0 %v188_v0 }
  0x1a   :  { %169 = vmatpush3.bf16.msra.mxu0 %v184_v7 }
  0x1b   :  { %170 = vmatprep.subr.bf16.mxu0 %v188_v0 }
  0x1e   :  { %171 = vmatpush3.bf16.msra.mxu0 %v185_v8 }
  0x21   :  { %173 = vmatmul.mubr.bf16.vlgmr.msra.gmra.mrb[0].mxu0 %v18_v9 }
  0xf4   :  { %v124_v11 = vpop.f32.mrb[0].mxu0 }
  0xf5   :  { %v125_v13 = vadd.f32 %v138_v10, %v124_v11  ;;  %v174_v14 = vpop.f32.mrb[1].mxu0 }
  0xf6   :  { %v127_v15 = vpop.f32.mrb[2].mxu0 }
  0xf7   :  { %v131_v16 = vadd.f32 %v130_v12, %v125_v13  ;;  %v175_v17 = vpop.f32.mrb[3].mxu0 }
  0xf9   :  { %186 = vtanh.f32 %v131_v16 }
 0x103   :  { %v187_v18 = vpop.eup %186 }
 0x104   :  { %133 = vst [vmem:[%s255_s4] sm:$0xff] %v187_v18 }

</bundles_post_ra>
